<compile_context>
chip_gen: v7x
topology: tpu7x:2x2x1
jax: 0.10.0
libtpu: 0.0.40
codegen_flags: <defaults>
</compile_context>

<pallas_src>
import jax
import jax.numpy as jnp
from jax.experimental import pallas as pl
from jax.experimental.pallas import tpu as pltpu


def _round_up(n: int, m: int) -> int:
    return ((n + m - 1) // m) * m


def neumf_kernel(x_ref, y_ref, wx_ref, wy_ref, b_ref, o_ref):
    # x_ref: [TB, Fx], y_ref: [TB, Fy]                    (one batch tile each)
    # wx_ref: [Fx, O], wy_ref: [Fy, O], b_ref: [1, O]     (resident, full arrays)
    # o_ref: [TB, O]
    x = x_ref[...].astype(jnp.float32)
    y = y_ref[...].astype(jnp.float32)

    # cat(x, y, dim=1) @ W  ==  x @ W[:Fx] + y @ W[Fx:]   (concat fused away)
    logits = jnp.dot(x, wx_ref[...], preferred_element_type=jnp.float32)
    logits += jnp.dot(y, wy_ref[...], preferred_element_type=jnp.float32)
    logits += b_ref[...]

    o_ref[...] = jax.nn.sigmoid(logits)


def neumf_forward(x, y, weight, bias, *, block_b=1024, act_dtype=jnp.float32):
    """NeuMF forward: sigmoid(cat(x, y, dim=1) @ weight + bias).

    x: [B, Fx], y: [B, Fy], weight: [Fx+Fy, O] (transpose of nn.Linear.weight),
    bias: [1, O].  Returns [B, O] float32.
    """
    B, fx = x.shape
    _, fy = y.shape
    out_dim = weight.shape[1]
    assert weight.shape[0] == fx + fy

    # Split the first-layer weight so the concat never materializes in HBM.
    wx = weight[:fx].astype(jnp.float32)
    wy = weight[fx:].astype(jnp.float32)
    bias = bias.astype(jnp.float32)

    # Activations may be narrowed (bf16) to halve HBM traffic; math stays f32.
    x = x.astype(act_dtype)
    y = y.astype(act_dtype)

    # Batch tile: as large as requested, multiple of 16 rows, never larger
    # than the (padded) batch.  Per-tile VMEM footprint is tiny, so one tile
    # size works across v5e / v6e / v7x scoped-VMEM limits.
    tb = _round_up(min(block_b, _round_up(B, 16)), 16)
    bp = _round_up(B, tb)
    if bp != B:
        x = jnp.pad(x, ((0, bp - B), (0, 0)))
        y = jnp.pad(y, ((0, bp - B), (0, 0)))

    grid = (bp // tb,)

    out = pl.pallas_call(
        neumf_kernel,
        out_shape=jax.ShapeDtypeStruct((bp, out_dim), jnp.float32),
        grid=grid,
        in_specs=[
            pl.BlockSpec((tb, fx), lambda i: (i, 0)),        # x batch tile
            pl.BlockSpec((tb, fy), lambda i: (i, 0)),        # y batch tile
            pl.BlockSpec((fx, out_dim), lambda i: (0, 0)),   # resident W[:Fx]
            pl.BlockSpec((fy, out_dim), lambda i: (0, 0)),   # resident W[Fx:]
            pl.BlockSpec((1, out_dim), lambda i: (0, 0)),    # resident bias
        ],
        out_specs=pl.BlockSpec((tb, out_dim), lambda i: (i, 0)),
        compiler_params=pltpu.CompilerParams(
            dimension_semantics=("parallel",)),
    )(x, y, wx, wy, bias)

    return out[:B]


def neumf_reference(x, y, weight, bias):
    """Pure-JAX reference of the PyTorch forward for a sanity check."""
    cat = jnp.concatenate([x.astype(jnp.float32), y.astype(jnp.float32)], axis=1)
    return jax.nn.sigmoid(cat @ weight + bias)


if __name__ == "__main__":
    # Shapes implied by the module: forward(x, y) with cat along dim=1 giving
    # stack_dim=2 features, Linear(2 -> 1), Sigmoid.
    B = 8
    FX, FY = 1, 1
    STACK_DIM, OUT_DIM = FX + FY, 1

    key = jax.random.PRNGKey(0)
    kx, ky, kw, kb = jax.random.split(key, 4)
    x = jax.random.normal(kx, (B, FX), jnp.float32)
    y = jax.random.normal(ky, (B, FY), jnp.float32)

    bound = 1.0 / (STACK_DIM ** 0.5)  # PyTorch nn.Linear-style init scale
    weight = jax.random.uniform(kw, (STACK_DIM, OUT_DIM), jnp.float32, -bound, bound)
    bias = jax.random.uniform(kb, (1, OUT_DIM), jnp.float32, -bound, bound)

    # 1) f32 activations, exact check against the pure-JAX reference.
    out = jax.block_until_ready(neumf_forward(x, y, weight, bias))
    ref = neumf_reference(x, y, weight, bias)
    assert out.shape == (B, OUT_DIM), out.shape
    assert jnp.allclose(out, ref, atol=1e-6, rtol=1e-6), "f32 mismatch vs reference"

    # 2) Exercise the batch grid (multiple tiles + padding) and the bf16
    #    HBM-traffic option on a slightly larger, non-tile-aligned batch.
    B2 = 300
    k2x, k2y = jax.random.split(jax.random.PRNGKey(1), 2)
    x2 = jax.random.normal(k2x, (B2, FX), jnp.float32)
    y2 = jax.random.normal(k2y, (B2, FY), jnp.float32)
    out2 = jax.block_until_ready(
        neumf_forward(x2, y2, weight, bias, block_b=128, act_dtype=jnp.bfloat16))
    ref2 = neumf_reference(x2, y2, weight, bias)
    assert out2.shape == (B2, OUT_DIM), out2.shape
    assert jnp.allclose(out2, ref2, atol=2e-2, rtol=2e-2), "bf16 mismatch vs reference"

    print("KERNEL_OK")
</pallas_src>

<mosaic_0001>
module attributes {stable_mosaic.version = 11 : i64} {
  func.func @neumf_kernel(%arg0: i32, %arg1: memref<16x1xf32, #tpu.memory_space<vmem>>, %arg2: memref<16x1xf32, #tpu.memory_space<vmem>>, %arg3: memref<1x1xf32, #tpu.memory_space<vmem>>, %arg4: memref<1x1xf32, #tpu.memory_space<vmem>>, %arg5: memref<1x1xf32, #tpu.memory_space<vmem>>, %arg6: memref<16x1xf32, #tpu.memory_space<vmem>>) attributes {dimension_semantics = [#tpu.dimension_semantics<parallel>], iteration_bounds = array<i64: 1>, scalar_prefetch = 0 : i64, scratch_operands = 0 : i64, tpu.core_type = #tpu.core_type<tc>, window_params = [{transform_indices = @transform_0, window_bounds = array<i64: 16, 1>}, {transform_indices = @transform_1, window_bounds = array<i64: 16, 1>}, {pipeline_mode = #tpu.pipeline_mode<synchronous>, transform_indices = @transform_2, window_bounds = array<i64: 1, 1>}, {pipeline_mode = #tpu.pipeline_mode<synchronous>, transform_indices = @transform_3, window_bounds = array<i64: 1, 1>}, {pipeline_mode = #tpu.pipeline_mode<synchronous>, transform_indices = @transform_4, window_bounds = array<i64: 1, 1>}, {transform_indices = @transform_5, window_bounds = array<i64: 16, 1>}]} {
    %c0 = arith.constant 0 : index
    %c0_0 = arith.constant 0 : index
    %0 = vector.load %arg1[%c0, %c0_0] : memref<16x1xf32, #tpu.memory_space<vmem>>, vector<16x1xf32>
    %c0_1 = arith.constant 0 : index
    %c0_2 = arith.constant 0 : index
    %1 = vector.load %arg2[%c0_1, %c0_2] : memref<16x1xf32, #tpu.memory_space<vmem>>, vector<16x1xf32>
    %c0_3 = arith.constant 0 : index
    %c0_4 = arith.constant 0 : index
    %2 = vector.load %arg3[%c0_3, %c0_4] : memref<1x1xf32, #tpu.memory_space<vmem>>, vector<1x1xf32>
    %cst = arith.constant dense<0.000000e+00> : vector<16x1xf32>
    %3 = tpu.matmul %0, %2, %cst {dimension_numbers = #tpu.dot_dimension_numbers<[1], [0], [0], [1], [0, 0, 1, 1], [], []>} : vector<16x1xf32>, vector<1x1xf32>, vector<16x1xf32> -> vector<16x1xf32>
    %c0_5 = arith.constant 0 : index
    %c0_6 = arith.constant 0 : index
    %4 = vector.load %arg4[%c0_5, %c0_6] : memref<1x1xf32, #tpu.memory_space<vmem>>, vector<1x1xf32>
    %cst_7 = arith.constant dense<0.000000e+00> : vector<16x1xf32>
    %5 = tpu.matmul %1, %4, %cst_7 {dimension_numbers = #tpu.dot_dimension_numbers<[1], [0], [0], [1], [0, 0, 1, 1], [], []>} : vector<16x1xf32>, vector<1x1xf32>, vector<16x1xf32> -> vector<16x1xf32>
    %6 = arith.addf %3, %5 : vector<16x1xf32>
    %c0_8 = arith.constant 0 : index
    %c0_9 = arith.constant 0 : index
    %7 = vector.load %arg5[%c0_8, %c0_9] : memref<1x1xf32, #tpu.memory_space<vmem>>, vector<1x1xf32>
    %8 = vector.broadcast %7 : vector<1x1xf32> to vector<16x1xf32>
    %9 = arith.addf %6, %8 : vector<16x1xf32>
    %10 = arith.negf %9 : vector<16x1xf32>
    %11 = math.exp %10 : vector<16x1xf32>
    %cst_10 = arith.constant 1.000000e+00 : f32
    %12 = vector.broadcast %cst_10 : f32 to vector<16x1xf32>
    %13 = arith.addf %12, %11 : vector<16x1xf32>
    %14 = arith.divf %12, %13 : vector<16x1xf32>
    %c0_11 = arith.constant 0 : index
    %c0_12 = arith.constant 0 : index
    %15 = vector.load %arg6[%c0_11, %c0_12] : memref<16x1xf32, #tpu.memory_space<vmem>>, vector<16x1xf32>
    tpu.vector_store %arg6[%c0_11, %c0_12], %14 {strides = array<i32>} : memref<16x1xf32, #tpu.memory_space<vmem>>, vector<16x1xf32>,
    return
  }
  func.func @transform_0(%arg0: i32) -> (i32, i32) {
    %c0_i32 = arith.constant 0 : i32
    %c0_i32_0 = arith.constant 0 : i32
    return %arg0, %c0_i32 : i32, i32
  }
  func.func @transform_1(%arg0: i32) -> (i32, i32) {
    %c0_i32 = arith.constant 0 : i32
    %c0_i32_0 = arith.constant 0 : i32
    return %arg0, %c0_i32 : i32, i32
  }
  func.func @transform_2(%arg0: i32) -> (i32, i32) {
    %c0_i32 = arith.constant 0 : i32
    %c0_i32_0 = arith.constant 0 : i32
    %c0_i32_1 = arith.constant 0 : i32
    return %c0_i32, %c0_i32_0 : i32, i32
  }
  func.func @transform_3(%arg0: i32) -> (i32, i32) {
    %c0_i32 = arith.constant 0 : i32
    %c0_i32_0 = arith.constant 0 : i32
    %c0_i32_1 = arith.constant 0 : i32
    return %c0_i32, %c0_i32_0 : i32, i32
  }
  func.func @transform_4(%arg0: i32) -> (i32, i32) {
    %c0_i32 = arith.constant 0 : i32
    %c0_i32_0 = arith.constant 0 : i32
    %c0_i32_1 = arith.constant 0 : i32
    return %c0_i32, %c0_i32_0 : i32, i32
  }
  func.func @transform_5(%arg0: i32) -> (i32, i32) {
    %c0_i32 = arith.constant 0 : i32
    %c0_i32_0 = arith.constant 0 : i32
    return %arg0, %c0_i32 : i32, i32
  }
}

</mosaic_0001>

<bundles_post_ra>
// kernel: tpu_custom_call.1
= control target key start
LH: loop header
LB: loop body
LE: loop exit
PB: predicated region body
PF: predicated region fallthrough
CT: control target
= control target key end

     0   :  { %vm32_vm0 = vcmask 7168   ;;  %vm39_vm1 = vcmask 1040384   ;;  %s327_s3 = inlined_call_operand.<no memory space> [shape: f32[1,1], index: 3, kind: input, shape index: {}]   ;;  %s328_s2 = inlined_call_operand.<no memory space> [shape: f32[1,1], index: 2, kind: input, shape index: {}]   ;;  %s329_s1 = inlined_call_operand.vmem [shape: f32[16,1], index: 1, kind: input, shape index: {}]   ;;  %s330_s0 = inlined_call_operand.vmem [shape: f32[16,1], index: 0, kind: input, shape index: {}]   ;;  %s331_s4 = inlined_call_operand.<no memory space> [shape: f32[1,1], index: 4, kind: input, shape index: {}]   ;;  %s332_s5 = inlined_call_operand.vmem [shape: f32[16,1], index: 5, kind: output, shape index: {}]  }
   0x1   :  { %v12_v0 = vstv %s327_s3  ;;  %v10_v1 = vstv %s328_s2  ;;  %v28_v2 = vld [vmem:[%s329_s1] sm:$0xff]  ;;  %v29_v4 = vld [vmem:[%s329_s1 + $0x8] sm:$0xff] }
   0x2   :  { %13 = vst [vmem:[#allocation3] sm:$0x1] %v12_v0  ;;  %11 = vst [vmem:[#allocation2] sm:$0x1] %v10_v1  ;;  %246 = vmatprep.mubr.msk.f32.mxu1 %vm32_vm0, %v28_v2  ;;  %v26_v3 = vld [vmem:[%s330_s0] sm:$0xff]  ;;  %v27_v7 = vld [vmem:[%s330_s0 + $0x8] sm:$0xff]  ;;  %v14_v8 = vstv %s331_s4 }
   0x3   :  { %251 = vmatprep.mubr.msk.f32.mxu0 %vm32_vm0, %v26_v3  ;;  %15 = vst [vmem:[#allocation4] sm:$0x1] %v14_v8 }
   0x9   :  { %v31_v5 = vld [vmem:[#allocation3] sm:$0x1]  ;;  %v30_v6 = vld [vmem:[#allocation2] sm:$0x1] }
   0xa   :  { %244 = vmatprep.subr.msk.mxu1 %vm39_vm1, %v31_v5  ;;  %249 = vmatprep.subr.msk.mxu0 %vm39_vm1, %v30_v6  ;;  %v235_v11 = vld [vmem:[#allocation4] ss:$0 sm:$0xff] }
   0xb   :  { %245 = vmatpush3.msk.msra.mxu1 %vm39_vm1, %v31_v5  ;;  %250 = vmatpush3.msk.msra.mxu0 %vm39_vm1, %v30_v6 }
   0xc   :  { %247 = vmatmul.mubr.msk.f32.vlgmr.msra.gmra.mrb[0].mxu1 %vm32_vm0, %v29_v4  ;;  %252 = vmatmul.mubr.msk.f32.vlgmr.msra.gmra.mrb[0].mxu0 %vm32_vm0, %v27_v7 }
  0xdf   :  { %v248_v9 = vpop.f32.mrb[0].mxu1  ;;  %v253_v10 = vpop.f32.mrb[0].mxu0 }
  0xe0   :  { %v199_v12 = vadd.f32 %v253_v10, %v248_v9  ;;  %v109_v13 = vpop.f32.mrb[1].mxu1  ;;  %v193_v14 = vpop.f32.mrb[1].mxu0 }
  0xe1   :  { %v194_v15 = vadd.f32 %v193_v14, %v109_v13 }
  0xe2   :  { %v210_v16 = vadd.f32 %v235_v11, %v199_v12 }
  0xe3   :  { %v209_v17 = vadd.f32 %v235_v11, %v194_v15 }
  0xe4   :  { %v237_v18 = vmul.f32 -1.442695, %v210_v16 }
  0xe5   :  { %v236_v19 = vmul.f32 -1.442695, %v209_v17 }
  0xe6   :  { %256 = vpow2.f32 %v237_v18 }
  0xe7   :  { %258 = vpow2.f32 %v236_v19 }
  0xf0   :  { %v257_v20 = vpop.eup %256 }
  0xf1   :  { %v259_v21 = vpop.eup %258  ;;  %v218_v22 = vadd.f32 1.0, %v257_v20 }
  0xf2   :  { %v217_v23 = vadd.f32 1.0, %v259_v21 }
  0xf3   :  { %260 = vrcp.f32 %v218_v22 }
  0xf4   :  { %262 = vrcp.f32 %v217_v23 }
  0xfd   :  { %v261_v24 = vpop.eup %260 }
  0xfe   :  { %v263_v25 = vpop.eup %262  ;;  %224 = vst.msk [vmem:[%s332_s5 + $0x8] sm:$0xff] %vm32_vm0, %v261_v24 }
  0xff   :  { %223 = vst.msk [vmem:[%s332_s5] sm:$0xff] %vm32_vm0, %v263_v25 }

</bundles_post_ra>
